<compile_context>
chip_gen: v7x
topology: tpu7x:2x2x1
jax: 0.10.0
libtpu: 0.0.40
codegen_flags: <defaults>
</compile_context>

<pallas_src>
import jax
import jax.numpy as jnp
from jax.experimental import pallas as pl
from jax.experimental.pallas import tpu as pltpu


def _round_up(n, m):
    return ((n + m - 1) // m) * m


def mlp_kernel(x_ref, w1_ref, b1_ref, w2_ref, b2_ref, w3_ref, b3_ref, o_ref):
    x = x_ref[...]                       # (2, TB)  f32, lane-dense
    w1 = w1_ref[...]                     # (64, 2)

    # Layer 1: (64, 2) @ (2, TB), K=2 -> two VPU broadcast multiply-adds (skip MXU).
    h1 = (w1[:, 0:1] * x[0:1, :]
          + w1[:, 1:2] * x[1:2, :]
          + b1_ref[...])                 # (64, TB)
    h1 = jnp.maximum(h1, 0.0)

    # Layer 2: the only real contraction (K=64) -> MXU.
    h2 = jnp.dot(w2_ref[...], h1, preferred_element_type=jnp.float32)
    h2 = jnp.maximum(h2 + b2_ref[...], 0.0)           # (32, TB)

    # Layer 3: (1, 32) @ (32, TB), M=1 -> elementwise multiply + sublane (XLU) reduce.
    out = jnp.sum(w3_ref[...] * h2, axis=0, keepdims=True) + b3_ref[...]   # (1, TB)
    o_ref[...] = out.astype(o_ref.dtype)


def api_predictor_forward(x, params, *, tb=2048):
    """x: (B, 2) float32.  params: PyTorch-layout (out,in) weights and (out,) biases."""
    w1, b1, w2, b2, w3, b3 = params
    B = x.shape[0]

    # Batch tile: multiple of 128 (lane-dense), capped at tb; pad the batch to a whole
    # number of tiles so every grid step sees a full block (pad rows compute garbage that
    # is sliced away afterwards -- no correctness impact).
    tb_eff = min(tb, _round_up(max(B, 1), 128))
    b_pad = _round_up(max(B, 1), tb_eff)
    grid = (b_pad // tb_eff,)

    # Lane-dense transposed input, zero-padded to the tile boundary.
    xt = jnp.zeros((2, b_pad), jnp.float32).at[:, :B].set(x.T.astype(jnp.float32))

    # Kernel-layout params (tiny; constant index_maps keep them VMEM-resident).
    w1k = w1.astype(jnp.float32)                      # (64, 2)
    w2k = w2.astype(jnp.float32)                      # (32, 64)
    b1c = b1.reshape(64, 1).astype(jnp.float32)
    b2c = b2.reshape(32, 1).astype(jnp.float32)
    w3c = w3.reshape(1, 32).T.astype(jnp.float32)     # (32, 1) column for the reduce
    b3c = b3.reshape(1, 1).astype(jnp.float32)

    const = lambda i: (0, 0)
    grid_spec = pltpu.PrefetchScalarGridSpec(
        num_scalar_prefetch=0,
        grid=grid,
        in_specs=[
            pl.BlockSpec((2, tb_eff), lambda i: (0, i)),   # x tile (streamed / pipelined)
            pl.BlockSpec((64, 2), const),                  # w1 (resident)
            pl.BlockSpec((64, 1), const),                  # b1
            pl.BlockSpec((32, 64), const),                 # w2
            pl.BlockSpec((32, 1), const),                  # b2
            pl.BlockSpec((32, 1), const),                  # w3 column
            pl.BlockSpec((1, 1), const),                   # b3
        ],
        out_specs=pl.BlockSpec((1, tb_eff), lambda i: (0, i)),
    )

    flops = 2 * b_pad * (2 * 64 + 64 * 32 + 32 * 1)
    bytes_accessed = 4 * (b_pad * (2 + 1) + 64 * 2 + 64 + 32 * 64 + 32 + 32 + 1)
    cost = pl.CostEstimate(flops=flops, transcendentals=0, bytes_accessed=bytes_accessed)

    out_t = pl.pallas_call(
        mlp_kernel,
        out_shape=jax.ShapeDtypeStruct((1, b_pad), jnp.float32),
        grid_spec=grid_spec,
        compiler_params=pltpu.CompilerParams(
            dimension_semantics=("parallel",),   # megacore sharding of batch tiles on v7x
            vmem_limit_bytes=32 << 20,           # plenty of headroom for double buffering
        ),
        cost_estimate=cost,
    )(xt, w1k, b1c, w2k, b2c, w3c, b3c)

    # Back to the module's (B, 1) layout.
    return out_t[0, :B].reshape(B, 1)


def init_params(key):
    # Deterministic init mimicking nn.Linear's uniform(-1/sqrt(fan_in), ..) bounds, PyTorch layout.
    k1, k2, k3, k4, k5, k6 = jax.random.split(key, 6)

    def lin(kw, kb, fan_in, fan_out):
        bound = 1.0 / jnp.sqrt(float(fan_in))
        w = jax.random.uniform(kw, (fan_out, fan_in), jnp.float32, -bound, bound)
        b = jax.random.uniform(kb, (fan_out,), jnp.float32, -bound, bound)
        return w, b

    w1, b1 = lin(k1, k2, 2, 64)
    w2, b2 = lin(k3, k4, 64, 32)
    w3, b3 = lin(k5, k6, 32, 1)
    return w1, b1, w2, b2, w3, b3


def reference_forward(x, params):
    w1, b1, w2, b2, w3, b3 = params
    h1 = jnp.maximum(x @ w1.T + b1, 0.0)
    h2 = jnp.maximum(h1 @ w2.T + b2, 0.0)
    return h2 @ w3.T + b3


if __name__ == "__main__":
    key = jax.random.PRNGKey(0)
    kx, kp = jax.random.split(key)
    params = init_params(kp)

    # Small shape consistent with the module: (batch=8, features=2).
    x = jax.random.normal(kx, (8, 2), dtype=jnp.float32)
    out = jax.block_until_ready(api_predictor_forward(x, params))
    ref = reference_forward(x, params)
    assert out.shape == (8, 1)
    assert jnp.allclose(out, ref, atol=1e-4, rtol=1e-4)

    # Also exercise a multi-step grid with a ragged batch (300 rows, TB=128 -> 3 tiles).
    x2 = jax.random.normal(jax.random.PRNGKey(1), (300, 2), dtype=jnp.float32)
    out2 = jax.block_until_ready(api_predictor_forward(x2, params, tb=128))
    ref2 = reference_forward(x2, params)
    assert out2.shape == (300, 1)
    assert jnp.allclose(out2, ref2, atol=1e-4, rtol=1e-4)

    print("KERNEL_OK")
</pallas_src>

<mosaic_0001>
module attributes {stable_mosaic.version = 11 : i64} {
  func.func @mlp_kernel(%arg0: i32, %arg1: memref<2x128xf32, #tpu.memory_space<vmem>>, %arg2: memref<64x2xf32, #tpu.memory_space<vmem>>, %arg3: memref<64x1xf32, #tpu.memory_space<vmem>>, %arg4: memref<32x64xf32, #tpu.memory_space<vmem>>, %arg5: memref<32x1xf32, #tpu.memory_space<vmem>>, %arg6: memref<32x1xf32, #tpu.memory_space<vmem>>, %arg7: memref<1x1xf32, #tpu.memory_space<vmem>>, %arg8: memref<1x128xf32, #tpu.memory_space<vmem>>) attributes {dimension_semantics = [#tpu.dimension_semantics<parallel>], iteration_bounds = array<i64: 1>, scalar_prefetch = 0 : i64, scratch_operands = 0 : i64, tpu.core_type = #tpu.core_type<tc>, window_params = [{transform_indices = @transform_0, window_bounds = array<i64: 2, 128>}, {pipeline_mode = #tpu.pipeline_mode<synchronous>, transform_indices = @transform_1, window_bounds = array<i64: 64, 2>}, {pipeline_mode = #tpu.pipeline_mode<synchronous>, transform_indices = @transform_2, window_bounds = array<i64: 64, 1>}, {pipeline_mode = #tpu.pipeline_mode<synchronous>, transform_indices = @transform_3, window_bounds = array<i64: 32, 64>}, {pipeline_mode = #tpu.pipeline_mode<synchronous>, transform_indices = @transform_4, window_bounds = array<i64: 32, 1>}, {pipeline_mode = #tpu.pipeline_mode<synchronous>, transform_indices = @transform_5, window_bounds = array<i64: 32, 1>}, {pipeline_mode = #tpu.pipeline_mode<synchronous>, transform_indices = @transform_6, window_bounds = array<i64: 1, 1>}, {transform_indices = @transform_7, window_bounds = array<i64: 1, 128>}]} {
    %c0 = arith.constant 0 : index
    %c0_0 = arith.constant 0 : index
    %0 = vector.load %arg1[%c0, %c0_0] : memref<2x128xf32, #tpu.memory_space<vmem>>, vector<2x128xf32>
    %c0_1 = arith.constant 0 : index
    %c0_2 = arith.constant 0 : index
    %1 = vector.load %arg2[%c0_1, %c0_2] : memref<64x2xf32, #tpu.memory_space<vmem>>, vector<64x2xf32>
    %2 = vector.extract_strided_slice %1 {offsets = [0, 0], sizes = [64, 1], strides = [1, 1]} : vector<64x2xf32> to vector<64x1xf32>
    %3 = vector.extract_strided_slice %0 {offsets = [0, 0], sizes = [1, 128], strides = [1, 1]} : vector<2x128xf32> to vector<1x128xf32>
    %4 = vector.broadcast %2 : vector<64x1xf32> to vector<64x128xf32>
    %5 = vector.broadcast %3 : vector<1x128xf32> to vector<64x128xf32>
    %6 = arith.mulf %4, %5 : vector<64x128xf32>
    %7 = vector.extract_strided_slice %1 {offsets = [0, 1], sizes = [64, 1], strides = [1, 1]} : vector<64x2xf32> to vector<64x1xf32>
    %8 = vector.extract_strided_slice %0 {offsets = [1, 0], sizes = [1, 128], strides = [1, 1]} : vector<2x128xf32> to vector<1x128xf32>
    %9 = vector.broadcast %7 : vector<64x1xf32> to vector<64x128xf32>
    %10 = vector.broadcast %8 : vector<1x128xf32> to vector<64x128xf32>
    %11 = arith.mulf %9, %10 : vector<64x128xf32>
    %12 = arith.addf %6, %11 : vector<64x128xf32>
    %c0_3 = arith.constant 0 : index
    %c0_4 = arith.constant 0 : index
    %13 = vector.load %arg3[%c0_3, %c0_4] : memref<64x1xf32, #tpu.memory_space<vmem>>, vector<64x1xf32>
    %14 = vector.broadcast %13 : vector<64x1xf32> to vector<64x128xf32>
    %15 = arith.addf %12, %14 : vector<64x128xf32>
    %cst = arith.constant 0.000000e+00 : f32
    %16 = vector.broadcast %cst : f32 to vector<64x128xf32>
    %17 = arith.maximumf %15, %16 : vector<64x128xf32>
    %c0_5 = arith.constant 0 : index
    %c0_6 = arith.constant 0 : index
    %18 = vector.load %arg4[%c0_5, %c0_6] : memref<32x64xf32, #tpu.memory_space<vmem>>, vector<32x64xf32>
    %cst_7 = arith.constant dense<0.000000e+00> : vector<32x128xf32>
    %19 = tpu.matmul %18, %17, %cst_7 {dimension_numbers = #tpu.dot_dimension_numbers<[1], [0], [0], [1], [0, 0, 1, 1], [], []>} : vector<32x64xf32>, vector<64x128xf32>, vector<32x128xf32> -> vector<32x128xf32>
    %c0_8 = arith.constant 0 : index
    %c0_9 = arith.constant 0 : index
    %20 = vector.load %arg5[%c0_8, %c0_9] : memref<32x1xf32, #tpu.memory_space<vmem>>, vector<32x1xf32>
    %21 = vector.broadcast %20 : vector<32x1xf32> to vector<32x128xf32>
    %22 = arith.addf %19, %21 : vector<32x128xf32>
    %cst_10 = arith.constant 0.000000e+00 : f32
    %23 = vector.broadcast %cst_10 : f32 to vector<32x128xf32>
    %24 = arith.maximumf %22, %23 : vector<32x128xf32>
    %c0_11 = arith.constant 0 : index
    %c0_12 = arith.constant 0 : index
    %25 = vector.load %arg6[%c0_11, %c0_12] : memref<32x1xf32, #tpu.memory_space<vmem>>, vector<32x1xf32>
    %26 = vector.broadcast %25 : vector<32x1xf32> to vector<32x128xf32>
    %27 = arith.mulf %26, %24 : vector<32x128xf32>
    %cst_13 = arith.constant dense<0.000000e+00> : vector<128xf32>
    %28 = vector.multi_reduction <add>, %27, %cst_13 [0] : vector<32x128xf32> to vector<128xf32>
    %29 = vector.shape_cast %28 : vector<128xf32> to vector<1x128xf32>
    %c0_14 = arith.constant 0 : index
    %c0_15 = arith.constant 0 : index
    %30 = vector.load %arg7[%c0_14, %c0_15] : memref<1x1xf32, #tpu.memory_space<vmem>>, vector<1x1xf32>
    %31 = vector.broadcast %30 : vector<1x1xf32> to vector<1x128xf32>
    %32 = arith.addf %29, %31 : vector<1x128xf32>
    %c0_16 = arith.constant 0 : index
    %c0_17 = arith.constant 0 : index
    %33 = vector.load %arg8[%c0_16, %c0_17] : memref<1x128xf32, #tpu.memory_space<vmem>>, vector<1x128xf32>
    tpu.vector_store %arg8[%c0_16, %c0_17], %32 {strides = array<i32>} : memref<1x128xf32, #tpu.memory_space<vmem>>, vector<1x128xf32>,
    return
  }
  func.func @transform_0(%arg0: i32) -> (i32, i32) {
    %c0_i32 = arith.constant 0 : i32
    %c0_i32_0 = arith.constant 0 : i32
    return %c0_i32, %arg0 : i32, i32
  }
  func.func @transform_1(%arg0: i32) -> (i32, i32) {
    %c0_i32 = arith.constant 0 : i32
    %c0_i32_0 = arith.constant 0 : i32
    %c0_i32_1 = arith.constant 0 : i32
    return %c0_i32, %c0_i32_0 : i32, i32
  }
  func.func @transform_2(%arg0: i32) -> (i32, i32) {
    %c0_i32 = arith.constant 0 : i32
    %c0_i32_0 = arith.constant 0 : i32
    %c0_i32_1 = arith.constant 0 : i32
    return %c0_i32, %c0_i32_0 : i32, i32
  }
  func.func @transform_3(%arg0: i32) -> (i32, i32) {
    %c0_i32 = arith.constant 0 : i32
    %c0_i32_0 = arith.constant 0 : i32
    %c0_i32_1 = arith.constant 0 : i32
    return %c0_i32, %c0_i32_0 : i32, i32
  }
  func.func @transform_4(%arg0: i32) -> (i32, i32) {
    %c0_i32 = arith.constant 0 : i32
    %c0_i32_0 = arith.constant 0 : i32
    %c0_i32_1 = arith.constant 0 : i32
    return %c0_i32, %c0_i32_0 : i32, i32
  }
  func.func @transform_5(%arg0: i32) -> (i32, i32) {
    %c0_i32 = arith.constant 0 : i32
    %c0_i32_0 = arith.constant 0 : i32
    %c0_i32_1 = arith.constant 0 : i32
    return %c0_i32, %c0_i32_0 : i32, i32
  }
  func.func @transform_6(%arg0: i32) -> (i32, i32) {
    %c0_i32 = arith.constant 0 : i32
    %c0_i32_0 = arith.constant 0 : i32
    %c0_i32_1 = arith.constant 0 : i32
    return %c0_i32, %c0_i32_0 : i32, i32
  }
  func.func @transform_7(%arg0: i32) -> (i32, i32) {
    %c0_i32 = arith.constant 0 : i32
    %c0_i32_0 = arith.constant 0 : i32
    return %c0_i32, %arg0 : i32, i32
  }
}

</mosaic_0001>

<bundles_post_ra>
// kernel: tpu_custom_call.1
= control target key start
LH: loop header
LB: loop body
LE: loop exit
PB: predicated region body
PF: predicated region fallthrough
CT: control target
= control target key end

     0   :  { %s655_s0 = inlined_call_operand.vmem [shape: f32[2,128], index: 0, kind: input, shape index: {}]   ;;  %s656_s1 = inlined_call_operand.vmem [shape: f32[64,2], index: 1, kind: input, shape index: {}]   ;;  %s657_s2 = inlined_call_operand.vmem [shape: f32[64,1], index: 2, kind: input, shape index: {}]   ;;  %s658_s3 = inlined_call_operand.vmem [shape: f32[32,64], index: 3, kind: input, shape index: {}]   ;;  %s659_s4 = inlined_call_operand.vmem [shape: f32[32,1], index: 4, kind: input, shape index: {}]   ;;  %s660_s5 = inlined_call_operand.vmem [shape: f32[32,1], index: 5, kind: input, shape index: {}]   ;;  %s661_s6 = inlined_call_operand.<no memory space> [shape: f32[1,1], index: 6, kind: input, shape index: {}]   ;;  %s662_s7 = inlined_call_operand.hbm [shape: f32[1,128], index: 7, kind: output, shape index: {}]  }
   0x1   :  { %v12_v0 = vstv %s661_s6 }
   0x2   :  { %13 = vst [vmem:[#allocation2] sm:$0x1] %v12_v0 }
   0x3   :  { %v32_v1 = vld [vmem:[%s656_s1 + $0x10] sm:$0xff]  ;;  %v30_v2 = vld [vmem:[%s656_s1] sm:$0xff]  ;;  %v498_v3 = vmov 1   ;;  %v31_v5 = vld [vmem:[%s656_s1 + $0x8] sm:$0xff] }
   0x4   :  { %466 = vset.pattern.permute.xlu0 %v498_v3  ;;  %464 = vset.pattern.permute.xlu1 %v498_v3  ;;  %v34_v4 = vld [vmem:[%s656_s1 + $0x20] sm:$0xff]  ;;  %v36_v6 = vld [vmem:[%s656_s1 + $0x30] sm:$0xff]  ;;  %v33_v7 = vld [vmem:[%s656_s1 + $0x18] sm:$0xff] }
   0x5   :  { %99 = vperm.xlu0 %466, %v32_v1   ;;  %91 = vperm.xlu1 %464, %v30_v2  }
   0x9   :  { %107 = vperm.xlu0 %466, %v34_v4   ;;  %95 = vperm.xlu1 %464, %v31_v5  }
   0xa   :  { %14 = vsyncpa [#allocation4], 0  ;;  %v499_v8 = vmov 0   ;;  %v142_v9 = vld [vmem:[%s657_s2] sm:$0xff]  ;;  %v143_v10 = vld [vmem:[%s657_s2 + $0x8] sm:$0xff]  ;;  %vm234_vm0 = vcmask 523264   ;;  %v78_v32 = vlaneseq }
   0xb   :  { %v35_v11 = vld [vmem:[%s656_s1 + $0x28] sm:$0xff]  ;;  %v145_v12 = vld [vmem:[%s657_s2 + $0x18] sm:$0xff]  ;;  %v210_v14 = vld [vmem:[%s659_s4] sm:$0xff] }
   0xc   :  { %v147_v13 = vld [vmem:[%s657_s2 + $0x28] sm:$0xff]  ;;  %v144_v15 = vld [vmem:[%s657_s2 + $0x10] sm:$0xff]  ;;  %v336_v17 = vld [vmem:[%s660_s5] sm:$0xff]  ;;  %v624_v35 = vshrl.u32 %v78_v32, 7 }
   0xd   :  { %115 = vperm.xlu0 %466, %v36_v6   ;;  %465 = vset.pattern.permute.xlu1 %v499_v8  ;;  %v212_v16 = vld [vmem:[%s659_s4 + $0x10] sm:$0xff]  ;;  %v37_v18 = vld [vmem:[%s656_s1 + $0x38] sm:$0xff]  ;;  %v373_v20 = vld [vmem:[#allocation2] sm:$0x1] }
   0xe   :  { %55 = vperm.xlu1 %465, %v33_v7   ;;  %v338_v19 = vld [vmem:[%s660_s5 + $0x10] sm:$0xff]  ;;  %v146_v21 = vld [vmem:[%s657_s2 + $0x20] sm:$0xff]  ;;  %v149_v23 = vld [vmem:[%s657_s2 + $0x38] sm:$0xff]  ;;  %v124_v38 = vsub.s32 1, %v624_v35  ;;  %v80_v39 = vsub.s32 0, %v624_v35 }
   0xf   :  { %v148_v22 = vld [vmem:[%s657_s2 + $0x30] sm:$0xff]  ;;  %v211_v24 = vld [vmem:[%s659_s4 + $0x8] sm:$0xff]  ;;  %v213_v25 = vld [vmem:[%s659_s4 + $0x18] sm:$0xff] }
  0x10   :  { %v206_v26 = vld [vmem:[%s658_s3] sm:$0xff]  ;;  %v208_v27 = vld [vmem:[%s658_s3 + $0x10] sm:$0xff]  ;;  %v337_v28 = vld [vmem:[%s660_s5 + $0x8] sm:$0xff] }
  0x11   :  { %471 = vset.pattern.permute.xlu0 %v499_v8  ;;  %431 = vmatprep.mubr.msk.f32.mxu0 %vm234_vm0, %v206_v26  ;;  %v339_v29 = vld [vmem:[%s660_s5 + $0x18] sm:$0xff]  ;;  %v29_v40 = vld [vmem:[%s655_s0] sm:$0x3] }
  0x12   :  { %40 = vperm.xlu0 %471, %v30_v2   ;;  %467 = vset.pattern.permute.xlu1 %v498_v3  ;;  %v125_v43 = vrot.slane %v29_v40, %v124_v38  ;;  %v81_v44 = vrot.slane %v29_v40, %v80_v39 }
  0x13   :  { %103 = vperm.xlu1 %467, %v33_v7   ;;  %434 = vmatprep.mubr.msk.f32.mxu1 %vm234_vm0, %v208_v27 }
  0x16   :  { %45 = vperm.xlu0 %471, %v31_v5  }
  0x17   :  { %468 = vset.pattern.permute.xlu1 %v499_v8 }
  0x18   :  { %152 = vperm.xlu1 %468, %v142_v9  }
  0x1a   :  { %50 = vperm.xlu0 %471, %v32_v1  }
  0x1c   :  { %60 = vperm.xlu1 %468, %v34_v4  }
  0x1e   :  { %157 = vperm.xlu0 %471, %v143_v10  }
  0x20   :  { %65 = vperm.xlu1 %468, %v35_v11  }
  0x22   :  { %167 = vperm.xlu0 %471, %v145_v12  }
  0x24   :  { %469 = vset.pattern.permute.xlu1 %v498_v3 }
  0x25   :  { %111 = vperm.xlu1 %469, %v35_v11  }
  0x26   :  { %177 = vperm.xlu0 %471, %v147_v13  }
  0x29   :  { %470 = vset.pattern.permute.xlu1 %v499_v8 }
  0x2a   :  { %216 = vperm.xlu0 %471, %v210_v14   ;;  %162 = vperm.xlu1 %470, %v144_v15  }
  0x2e   :  { %226 = vperm.xlu0 %471, %v212_v16   ;;  %70 = vperm.xlu1 %470, %v36_v6  }
  0x32   :  { %342 = vperm.xlu0 %471, %v336_v17   ;;  %75 = vperm.xlu1 %470, %v37_v18  }
  0x36   :  { %352 = vperm.xlu0 %471, %v338_v19   ;;  %472 = vset.pattern.permute.xlu1 %v498_v3 }
  0x37   :  { %119 = vperm.xlu1 %472, %v37_v18  }
  0x3a   :  { %376 = vperm.xlu0 %471, %v373_v20  }
  0x3b   :  { %473 = vset.pattern.permute.xlu1 %v499_v8 }
  0x3c   :  { %172 = vperm.xlu1 %473, %v146_v21  }
  0x40   :  { %182 = vperm.xlu1 %473, %v148_v22  }
  0x44   :  { %187 = vperm.xlu1 %473, %v149_v23  }
  0x48   :  { %221 = vperm.xlu1 %473, %v211_v24  }
  0x4c   :  { %231 = vperm.xlu1 %473, %v213_v25  }
  0x50   :  { %347 = vperm.xlu1 %473, %v337_v28  }
  0x54   :  { %357 = vperm.xlu1 %473, %v339_v29  }
  0x84   :  { %v92_v30 = vpop.permute.xlu1 %91  ;;  %v100_v31 = vpop.permute.xlu0 %99 }
  0x85   :  { %v126_v48 = vmul.f32 %v125_v43, %v92_v30  ;;  %v128_v63 = vmul.f32 %v125_v43, %v100_v31 }
  0x88   :  { %v96_v33 = vpop.permute.xlu1 %95  ;;  %v108_v34 = vpop.permute.xlu0 %107 }
  0x89   :  { %v127_v51 = vmul.f32 %v125_v43, %v96_v33  ;;  %v130_v16 = vmul.f32 %v125_v43, %v108_v34 }
  0x8c   :  { %v116_v36 = vpop.permute.xlu0 %115 }
  0x8d   :  { %v56_v37 = vpop.permute.xlu1 %55  ;;  %v132_v26 = vmul.f32 %v125_v43, %v116_v36  ;;  %v207_v36 = vld [vmem:[%s658_s3 + $0x8] sm:$0xff] }
  0x8e   :  { %v85_v0 = vmul.f32 %v81_v44, %v56_v37 }
  0x91   :  { %v41_v41 = vpop.permute.xlu0 %40 }
  0x92   :  { %v104_v42 = vpop.permute.xlu1 %103  ;;  %v82_v46 = vmul.f32 %v81_v44, %v41_v41 }
  0x93   :  { %v129_v61 = vmul.f32 %v125_v43, %v104_v42 }
  0x94   :  { %v134_v52 = vadd.f32 %v126_v48, %v82_v46 }
  0x95   :  { %v46_v45 = vpop.permute.xlu0 %45  ;;  %v137_v4 = vadd.f32 %v129_v61, %v85_v0 }
  0x96   :  { %v83_v49 = vmul.f32 %v81_v44, %v46_v45 }
  0x97   :  { %v153_v47 = vpop.permute.xlu1 %152 }
  0x98   :  { %v190_v54 = vadd.f32 %v153_v47, %v134_v52  ;;  %v135_v55 = vadd.f32 %v127_v51, %v83_v49 }
  0x99   :  { %v51_v50 = vpop.permute.xlu0 %50 }
  0x9a   :  { %v198_v59 = vmax.f32 %v190_v54, 0.0  ;;  %v84_v1 = vmul.f32 %v81_v44, %v51_v50 }
  0x9b   :  { %v61_v53 = vpop.permute.xlu1 %60 }
  0x9c   :  { %v136_v6 = vadd.f32 %v128_v63, %v84_v1  ;;  %v86_v17 = vmul.f32 %v81_v44, %v61_v53 }
  0x9d   :  { %v158_v56 = vpop.permute.xlu0 %157 }
  0x9e   :  { %v191_v57 = vadd.f32 %v158_v56, %v135_v55  ;;  %v138_v22 = vadd.f32 %v130_v16, %v86_v17 }
  0x9f   :  { %v66_v58 = vpop.permute.xlu1 %65 }
  0xa0   :  { %v199_v60 = vmax.f32 %v191_v57, 0.0  ;;  %v87_v15 = vmul.f32 %v81_v44, %v66_v58 }
  0xa1   :  { %v168_v3 = vpop.permute.xlu0 %167 }
  0xa2   :  { %v437_v62 = vpack.c.bf16 %v199_v60, %v198_v59  ;;  %v193_v5 = vadd.f32 %v168_v3, %v137_v4 }
  0xa4   :  { %v112_v2 = vpop.permute.xlu1 %111  ;;  %438 = vmatprep.subr.bf16.mxu0 %v437_v62  ;;  %453 = vmatprep.subr.bf16.mxu1 %v437_v62  ;;  %v201_v9 = vmax.f32 %v193_v5, 0.0 }
  0xa5   :  { %440 = vmatpush3.bf16.msra.mxu0 %v437_v62  ;;  %457 = vmatpush3.bf16.msra.mxu1 %v437_v62  ;;  %v131_v14 = vmul.f32 %v125_v43, %v112_v2  ;;  %v178_v20 = vpop.permute.xlu0 %177 }
  0xa7   :  { %v139_v18 = vadd.f32 %v131_v14, %v87_v15 }
  0xa9   :  { %v163_v7 = vpop.permute.xlu1 %162  ;;  %v195_v21 = vadd.f32 %v178_v20, %v139_v18 }
  0xaa   :  { %v192_v8 = vadd.f32 %v163_v7, %v136_v6 }
  0xab   :  { %v203_v27 = vmax.f32 %v195_v21, 0.0 }
  0xac   :  { %v200_v10 = vmax.f32 %v192_v8, 0.0 }
  0xad   :  { %v71_v11 = vpop.permute.xlu1 %70 }
  0xae   :  { %v441_v12 = vpack.c.bf16 %v201_v9, %v200_v10  ;;  %v88_v24 = vmul.f32 %v81_v44, %v71_v11 }
  0xb0   :  { %442 = vmatprep.subr.bf16.mxu0 %v441_v12  ;;  %454 = vmatprep.subr.bf16.mxu1 %v441_v12  ;;  %v140_v33 = vadd.f32 %v132_v26, %v88_v24 }
  0xb1   :  { %v76_v13 = vpop.permute.xlu1 %75  ;;  %444 = vmatpush3.bf16.msra.mxu0 %v441_v12  ;;  %458 = vmatpush3.bf16.msra.mxu1 %v441_v12 }
  0xb2   :  { %v89_v31 = vmul.f32 %v81_v44, %v76_v13  ;;  %v217_v44 = vpop.permute.xlu0 %216 }
  0xb6   :  { %v120_v19 = vpop.permute.xlu1 %119  ;;  %v227_v47 = vpop.permute.xlu0 %226 }
  0xb7   :  { %v133_v28 = vmul.f32 %v125_v43, %v120_v19  ;;  %v209_v43 = vld [vmem:[%s658_s3 + $0x18] sm:$0xff]  ;;  %s500_s3 = smov [#allocation3]  }
  0xb8   :  { %s391_s8 = sshll.u32 %s500_s3, 4  ;;  %s392_s8 = int_to_ptr.vmem [resolvable:$true] %s391_s8 }
  0xb9   :  { %v141_v34 = vadd.f32 %v133_v28, %v89_v31  ;;  %s474_s9 = scalar_lea.vmem %s392_s8, 16  ;;  %s478_s6 = scalar_lea.vmem %s392_s8, 32 }
  0xba   :  { %v343_v49 = vpop.permute.xlu0 %342  ;;  %p475_p0 = scmp.ne.s32.totalorder %s392_s8, %s474_s9  ;;  %p479_p1 = scmp.lt.s32.totalorder %s392_s8, %s392_s8 }
  0xbb   :  { %v173_v23 = vpop.permute.xlu1 %172  ;;  %p480_p2 = scmp.lt.s32.totalorder %s478_s6, %s474_s9 }
  0xbc   :  { %v194_v25 = vadd.f32 %v173_v23, %v138_v22 }
  0xbd   :  { %p481_p3 = por %p480_p2, %p479_p1 }
  0xbe   :  { %v202_v29 = vmax.f32 %v194_v25, 0.0  ;;  %v353_v1 = vpop.permute.xlu0 %352 }
  0xbf   :  { %v183_v30 = vpop.permute.xlu1 %182  ;;  %p482_p4 = pnand %p481_p3, %p475_p0 }
  0xc0   :  { %v445_v32 = vpack.c.bf16 %v203_v27, %v202_v29  ;;  %v196_v37 = vadd.f32 %v183_v30, %v140_v33 }
  0xc2   :  { %446 = vmatprep.subr.bf16.mxu0 %v445_v32  ;;  %455 = vmatprep.subr.bf16.mxu1 %v445_v32  ;;  %v204_v41 = vmax.f32 %v196_v37, 0.0  ;;  %v377_v12 = vpop.permute.xlu0 %376 }
  0xc3   :  { %v188_v38 = vpop.permute.xlu1 %187  ;;  %448 = vmatpush3.bf16.msra.mxu0 %v445_v32  ;;  %459 = vmatpush3.bf16.msra.mxu1 %v445_v32  ;;  %v382_v14 = vrot.slane %v377_v12, %v80_v39 }
  0xc4   :  { %v197_v40 = vadd.f32 %v188_v38, %v141_v34 }
  0xc6   :  { %v205_v42 = vmax.f32 %v197_v40, 0.0 }
  0xc7   :  { %v222_v46 = vpop.permute.xlu1 %221 }
  0xc8   :  { %v449_v45 = vpack.c.bf16 %v205_v42, %v204_v41 }
  0xca   :  { %450 = vmatprep.subr.bf16.mxu0 %v449_v45  ;;  %456 = vmatprep.subr.bf16.mxu1 %v449_v45 }
  0xcb   :  { %452 = vmatpush3.bf16.msra.mxu0 %v449_v45  ;;  %460 = vmatpush3.bf16.msra.mxu1 %v449_v45  ;;  %v232_v48 = vpop.permute.xlu1 %231 }
  0xce   :  { %432 = vmatmul.mubr.msk.f32.vlgmr.msra.gmra.mrb[0].mxu0 %vm234_vm0, %v207_v36  ;;  %435 = vmatmul.mubr.msk.f32.vlgmr.msra.gmra.mrb[0].mxu1 %vm234_vm0, %v209_v43 }
  0xcf   :  { %v348_v58 = vpop.permute.xlu1 %347 }
  0xd3   :  { %v358_v4 = vpop.permute.xlu1 %357 }
 0x1a1   :  { %v433_v50 = vpop.f32.mrb[0].mxu0  ;;  %v436_v51 = vpop.f32.mrb[0].mxu1 }
 0x1a2   :  { %v319_v52 = vadd.f32 %v433_v50, %v222_v46  ;;  %v313_v53 = vpop.f32.mrb[1].mxu0  ;;  %v323_v54 = vpop.f32.mrb[1].mxu1  ;;  %v329_v55 = vadd.f32 %v436_v51, %v232_v48 }
 0x1a3   :  { %v314_v56 = vadd.f32 %v313_v53, %v217_v44  ;;  %v324_v57 = vadd.f32 %v323_v54, %v227_v47 }
 0x1a4   :  { %v333_v59 = vmax.f32 %v319_v52, 0.0  ;;  %v335_v63 = vmax.f32 %v329_v55, 0.0 }
 0x1a5   :  { %v332_v60 = vmax.f32 %v314_v56, 0.0  ;;  %v334_v61 = vmax.f32 %v324_v57, 0.0 }
 0x1a6   :  { %v361_v62 = vmul.f32 %v348_v58, %v333_v59  ;;  %v363_v5 = vmul.f32 %v358_v4, %v335_v63 }
 0x1a7   :  { %v360_v0 = vmul.f32 %v343_v49, %v332_v60  ;;  %v362_v3 = vmul.f32 %v353_v1, %v334_v61 }
 0x1a9   :  { %v364_v2 = vadd.f32 %v361_v62, %v360_v0 }
 0x1ab   :  { %v365_v6 = vadd.f32 %v364_v2, %v362_v3 }
 0x1ad   :  { %v366_v7 = vadd.f32 %v365_v6, %v363_v5 }
 0x1af   :  { %v367_v8 = vrot.slane %v366_v7, 4 }
 0x1b1   :  { %v368_v9 = vadd.f32 %v367_v8, %v366_v7 }
 0x1b3   :  { %v369_v10 = vrot.slane %v368_v9, 2 }
 0x1b5   :  { %v370_v11 = vadd.f32 %v369_v10, %v368_v9 }
 0x1b7   :  { %v371_v13 = vrot.slane %v370_v11, 1 }
 0x1b9   :  { %v372_v15 = vadd.f32 %v371_v13, %v370_v11 }
 0x1bb   :  { %v383_v16 = vadd.f32 %v382_v14, %v372_v15 }
 0x1bd   :  { %384 = vst [vmem:[#allocation3] sm:$0x1] %v383_v16 }
 0x1be   :  { %485 = shalt.err (!%p482_p4)
}
 0x1bf   :  { %s486_s12 = scalar_lea.hbm %s662_s7, 16 }
 0x1c0   :  { %p487_p5 = scmp.ne.s32.totalorder %s662_s7, %s486_s12  ;;  %p490_p6 = scmp.lt.u32.totalorder %s486_s12, %s662_s7 }
 0x1c2   :  { %p492_p7 = pnand %p490_p6, %p487_p5 }
 0x1c4   :  { %495 = shalt.err (!%p492_p7)
}
 0x1c5   :  { %394 = dma.vmem_to_hbm [thread:$0]  %s392_s8, 16, %s662_s7, [#allocation4]  }
 0x1c6   :  { %496 = dma.done.wait [#allocation4], 16  }
 0x1c7   :  { %497 = vsyncadd [#allocation4], 4294967280 }
 0x1c8   :  { %398 = vsyncpa [#allocation4], 1 }

</bundles_post_ra>
